<compile_context>
chip_gen: v5e
topology: v5e:2x2
jax: 0.10.0
libtpu: 0.0.40
codegen_flags: <defaults>
</compile_context>

<pallas_src>
import functools

import jax
import jax.numpy as jnp
from jax import lax
from jax.experimental import pallas as pl
from jax.experimental.pallas import tpu as pltpu


IN_FEATURES = 3 * 32 * 32            # 3072, fixed by the module definition
_INV_SQRT2 = 0.7071067811865476

_DEFAULT_MAX_ROWS = 1024             # v7x-safe: f32 x tile double-buffered ~= 25 MiB
_DEFAULT_VMEM_LIMIT = 56 * 1024 * 1024


def _round_up(v, m):
    return ((v + m - 1) // m) * m


def _gelu(x):
    # Exact (erf-based) GELU, matching torch.nn.GELU default. Computed in f32.
    return 0.5 * x * (1.0 + lax.erf(x * _INV_SQRT2))


def _tile_budget():
    """(max rows per batch tile, vmem_limit_bytes) chosen from the chip's VMEM."""
    try:
        vmem_cap = pltpu.get_tpu_info().vmem_capacity_bytes
    except Exception:  # pragma: no cover - conservative fallback
        return _DEFAULT_MAX_ROWS, _DEFAULT_VMEM_LIMIT
    if vmem_cap >= 100 * 1024 * 1024:            # v5e / v6e (128 MiB VMEM)
        return 2048, min(96 * 1024 * 1024, (3 * vmem_cap) // 4)
    return _DEFAULT_MAX_ROWS, _DEFAULT_VMEM_LIMIT  # v7x (64 MiB VMEM)


def _mlp_mixer_kernel(x_ref, w1_ref, b1_ref, w2_ref, b2_ref, w3_ref, b3_ref,
                      o_ref, *, sub_rows, n_full, tail_rows):
    """Fused 3-layer MLP on one [bt, 3072] batch tile.

    x arrives as f32 (half the HBM bytes of a separate bf16-convert pass) and
    is cast to bf16 per sub-block; matmuls accumulate in f32; bias adds and
    erf-GELU stay in f32.  The tile is processed in `n_full` sub-blocks of
    `sub_rows` rows (plus an optional static tail) so f32 intermediates stay
    within the vreg file.
    """

    def compute_rows(x_rows_f32):
        xb = x_rows_f32.astype(jnp.bfloat16)                       # cast under DMA slack
        h1 = jnp.dot(xb, w1_ref[...],
                     preferred_element_type=jnp.float32) + b1_ref[...]
        h1 = _gelu(h1).astype(jnp.bfloat16)
        h2 = jnp.dot(h1, w2_ref[...],
                     preferred_element_type=jnp.float32) + b2_ref[...]
        h2 = _gelu(h2).astype(jnp.bfloat16)
        out = jnp.dot(h2, w3_ref[...],
                      preferred_element_type=jnp.float32) + b3_ref[...]
        return out.astype(o_ref.dtype)

    if n_full == 1 and tail_rows == 0:
        o_ref[...] = compute_rows(x_ref[...])
    else:
        if n_full > 0:
            def sub_block(s, carry):
                r = pl.multiple_of(s * sub_rows, sub_rows)
                o_ref[pl.ds(r, sub_rows), :] = compute_rows(
                    x_ref[pl.ds(r, sub_rows), :])
                return carry

            # unroll kept at 2 to avoid vreg spills from interleaved f32 copies.
            lax.fori_loop(0, n_full, sub_block, 0, unroll=2)
        if tail_rows > 0:
            r0 = n_full * sub_rows
            o_ref[pl.ds(r0, tail_rows), :] = compute_rows(
                x_ref[pl.ds(r0, tail_rows), :])


def prepare_params(params):
    """Pre-cast / pre-pad the weights once (not on every forward call)."""
    H = params["w1"].shape[1]
    C = params["w3"].shape[1]
    C_pad = _round_up(max(C, 128), 128)          # lane-dense output stores
    w3p = jnp.pad(params["w3"].astype(jnp.float32),
                  ((0, 0), (0, C_pad - C))).astype(jnp.bfloat16)
    b3p = jnp.pad(params["b3"].astype(jnp.float32), ((0, C_pad - C),))
    # sub_rows * H ~= 16K f32 elements (~16 vregs) so intermediates don't spill.
    sub_rows = min(128, max(8, (16384 // max(H, 1)) // 8 * 8))
    return {
        "w1": params["w1"].astype(jnp.bfloat16),
        "w2": params["w2"].astype(jnp.bfloat16),
        "w3p": w3p,
        "b1r": params["b1"].astype(jnp.float32).reshape(1, H),
        "b2r": params["b2"].astype(jnp.float32).reshape(1, H),
        "b3r": b3p.reshape(1, C_pad),
        "hidden_dim": H,
        "num_classes": C,
        "padded_classes": C_pad,
        "sub_rows": sub_rows,
    }


def _run_tiles(x2d, prep, *, bt, n_tiles, vmem_limit):
    """One pallas_call covering rows [0, n_tiles*bt) of x2d with exact tiles."""
    H = prep["hidden_dim"]
    C_pad = prep["padded_classes"]
    sub = min(bt, prep["sub_rows"])
    n_full, tail = divmod(bt, sub)

    kernel = functools.partial(_mlp_mixer_kernel,
                               sub_rows=sub, n_full=n_full, tail_rows=tail)

    return pl.pallas_call(
        kernel,
        out_shape=jax.ShapeDtypeStruct((n_tiles * bt, C_pad), jnp.float32),
        grid_spec=pltpu.PrefetchScalarGridSpec(
            num_scalar_prefetch=0,
            grid=(n_tiles,),
            in_specs=[
                pl.BlockSpec((bt, IN_FEATURES), lambda i: (i, 0)),  # x tile (f32)
                pl.BlockSpec((IN_FEATURES, H), lambda i: (0, 0)),   # W1 (bf16, grid-invariant)
                pl.BlockSpec((1, H), lambda i: (0, 0)),             # b1 (f32)
                pl.BlockSpec((H, H), lambda i: (0, 0)),             # W2 (bf16)
                pl.BlockSpec((1, H), lambda i: (0, 0)),             # b2 (f32)
                pl.BlockSpec((H, C_pad), lambda i: (0, 0)),         # W3 (bf16, padded)
                pl.BlockSpec((1, C_pad), lambda i: (0, 0)),         # b3 (f32, padded)
            ],
            out_specs=pl.BlockSpec((bt, C_pad), lambda i: (i, 0)),
        ),
        compiler_params=pltpu.CompilerParams(
            # On v7x, pltpu.CORE_PARALLEL on this axis is the follow-up if plain
            # "parallel" does not shard the batch across the two TensorCores.
            dimension_semantics=("parallel",),
            vmem_limit_bytes=vmem_limit,
        ),
    )(x2d, prep["w1"], prep["b1r"], prep["w2"], prep["b2r"],
      prep["w3p"], prep["b3r"])


def fp2_mlp_mixer_forward(x_nchw, params, *, max_rows_per_tile=None,
                          vmem_limit_bytes=None):
    """Run the FP2MLPMixer forward pass.

    x_nchw: [B, 3, 32, 32] float32 (NCHW, like PyTorch)
    params: raw dict (w1,b1,w2,b2,w3,b3) or a prepare_params() dict.
    returns: [B, num_classes] float32
    """
    prep = params if "w3p" in params else prepare_params(params)
    C = prep["num_classes"]

    B = x_nchw.shape[0]
    # Flatten exactly like nn.Flatten on NCHW.  Stays f32: the bf16 cast happens
    # inside the kernel, so x is read from HBM exactly once.
    x = x_nchw.reshape(B, -1)
    if x.dtype != jnp.float32:
        x = x.astype(jnp.float32)
    assert x.shape[1] == IN_FEATURES

    max_rows, vmem_default = _tile_budget()
    if max_rows_per_tile is not None:
        max_rows = int(max_rows_per_tile)
    if vmem_limit_bytes is None:
        vmem_limit_bytes = vmem_default

    if B <= max_rows:
        # Single exact tile (block == full batch dim): no padding, no masking.
        out = _run_tiles(x, prep, bt=B, n_tiles=1, vmem_limit=vmem_limit_bytes)
        return out[:, :C]

    # Multi-tile: an even number of equal 8-aligned tiles (both v7x TCs get
    # work), plus a tiny remainder call — never pad or copy the bulk of x.
    n_steps = -(-B // max_rows)
    if n_steps % 2:
        n_steps += 1
    bt = max(8, (B // n_steps) // 8 * 8)
    n_tiles = B // bt
    rem = B - n_tiles * bt

    out = _run_tiles(x, prep, bt=bt, n_tiles=n_tiles,
                     vmem_limit=vmem_limit_bytes)
    if rem:
        out_rem = _run_tiles(x[n_tiles * bt:], prep, bt=rem, n_tiles=1,
                             vmem_limit=vmem_limit_bytes)
        out = jnp.concatenate([out, out_rem], axis=0)
    return out[:, :C]


def init_params(key, hidden_dim=128, num_classes=10):
    """Deterministic synthetic parameter init (shapes match the PyTorch module)."""
    k1, k2, k3, k4, k5, k6 = jax.random.split(key, 6)
    scale1 = 1.0 / jnp.sqrt(IN_FEATURES)
    scaleh = 1.0 / jnp.sqrt(hidden_dim)
    return {
        "w1": jax.random.uniform(k1, (IN_FEATURES, hidden_dim), jnp.float32,
                                 -scale1, scale1),
        "b1": jax.random.uniform(k2, (hidden_dim,), jnp.float32, -scale1, scale1),
        "w2": jax.random.uniform(k3, (hidden_dim, hidden_dim), jnp.float32,
                                 -scaleh, scaleh),
        "b2": jax.random.uniform(k4, (hidden_dim,), jnp.float32, -scaleh, scaleh),
        "w3": jax.random.uniform(k5, (hidden_dim, num_classes), jnp.float32,
                                 -scaleh, scaleh),
        "b3": jax.random.uniform(k6, (num_classes,), jnp.float32, -scaleh, scaleh),
    }


def _reference_forward(x_nchw, params):
    """Pure-JAX reference matching the kernel's bf16-operand / f32-accumulate math."""
    x = x_nchw.reshape(x_nchw.shape[0], -1).astype(jnp.bfloat16)
    w1 = params["w1"].astype(jnp.bfloat16)
    w2 = params["w2"].astype(jnp.bfloat16)
    w3 = params["w3"].astype(jnp.bfloat16)
    h = jnp.dot(x, w1, preferred_element_type=jnp.float32) + params["b1"]
    h = _gelu(h).astype(jnp.bfloat16)
    h = jnp.dot(h, w2, preferred_element_type=jnp.float32) + params["b2"]
    h = _gelu(h).astype(jnp.bfloat16)
    return jnp.dot(h, w3, preferred_element_type=jnp.float32) + params["b3"]


if __name__ == "__main__":
    key = jax.random.PRNGKey(0)
    k_x, k_p, k_x2 = jax.random.split(key, 3)

    HIDDEN, NUM_CLASSES = 128, 10
    params = init_params(k_p, hidden_dim=HIDDEN, num_classes=NUM_CLASSES)
    prep = prepare_params(params)                 # weights cast/padded once

    # Small canonical check (single exact tile, block == full batch dim).
    x_small = jax.random.normal(k_x, (2, 3, 32, 32), jnp.float32)   # NCHW
    out = jax.block_until_ready(fp2_mlp_mixer_forward(x_small, prep))
    ref = _reference_forward(x_small, params)
    assert out.shape == (2, NUM_CLASSES), out.shape
    assert jnp.allclose(out, ref, atol=2e-2, rtol=2e-2), (
        float(jnp.max(jnp.abs(out - ref))))

    # Single large tile: exercises the in-kernel sub-block loop + 4-row tail.
    x_mid = jax.random.normal(k_x2, (260, 3, 32, 32), jnp.float32)
    out_mid = jax.block_until_ready(fp2_mlp_mixer_forward(x_mid, prep))
    ref_mid = _reference_forward(x_mid, params)
    assert out_mid.shape == (260, NUM_CLASSES), out_mid.shape
    assert jnp.allclose(out_mid, ref_mid, atol=2e-2, rtol=2e-2), (
        float(jnp.max(jnp.abs(out_mid - ref_mid))))

    # Multi-step grid path: even number of exact tiles + tiny remainder call.
    out_multi = jax.block_until_ready(
        fp2_mlp_mixer_forward(x_mid, prep, max_rows_per_tile=96))
    assert out_multi.shape == (260, NUM_CLASSES), out_multi.shape
    assert jnp.allclose(out_multi, ref_mid, atol=2e-2, rtol=2e-2), (
        float(jnp.max(jnp.abs(out_multi - ref_mid))))

    print("KERNEL_OK")
</pallas_src>

<mosaic_0001>
module attributes {stable_mosaic.version = 11 : i64} {
  func.func @_mlp_mixer_kernel(%arg0: i32, %arg1: memref<2x3072xf32, #tpu.memory_space<vmem>>, %arg2: memref<3072x128xbf16, #tpu.memory_space<vmem>>, %arg3: memref<1x128xf32, #tpu.memory_space<vmem>>, %arg4: memref<128x128xbf16, #tpu.memory_space<vmem>>, %arg5: memref<1x128xf32, #tpu.memory_space<vmem>>, %arg6: memref<128x128xbf16, #tpu.memory_space<vmem>>, %arg7: memref<1x128xf32, #tpu.memory_space<vmem>>, %arg8: memref<2x128xf32, #tpu.memory_space<vmem>>) attributes {dimension_semantics = [#tpu.dimension_semantics<parallel>], iteration_bounds = array<i64: 1>, scalar_prefetch = 0 : i64, scratch_operands = 0 : i64, tpu.core_type = #tpu.core_type<tc>, window_params = [{transform_indices = @transform_0, window_bounds = array<i64: 2, 3072>}, {pipeline_mode = #tpu.pipeline_mode<synchronous>, transform_indices = @transform_1, window_bounds = array<i64: 3072, 128>}, {pipeline_mode = #tpu.pipeline_mode<synchronous>, transform_indices = @transform_2, window_bounds = array<i64: 1, 128>}, {pipeline_mode = #tpu.pipeline_mode<synchronous>, transform_indices = @transform_3, window_bounds = array<i64: 128, 128>}, {pipeline_mode = #tpu.pipeline_mode<synchronous>, transform_indices = @transform_4, window_bounds = array<i64: 1, 128>}, {pipeline_mode = #tpu.pipeline_mode<synchronous>, transform_indices = @transform_5, window_bounds = array<i64: 128, 128>}, {pipeline_mode = #tpu.pipeline_mode<synchronous>, transform_indices = @transform_6, window_bounds = array<i64: 1, 128>}, {transform_indices = @transform_7, window_bounds = array<i64: 2, 128>}]} {
    %c0 = arith.constant 0 : index
    %c0_0 = arith.constant 0 : index
    %0 = vector.load %arg1[%c0, %c0_0] : memref<2x3072xf32, #tpu.memory_space<vmem>>, vector<2x3072xf32>
    %1 = arith.truncf %0 : vector<2x3072xf32> to vector<2x3072xbf16>
    %c0_1 = arith.constant 0 : index
    %c0_2 = arith.constant 0 : index
    %2 = vector.load %arg2[%c0_1, %c0_2] : memref<3072x128xbf16, #tpu.memory_space<vmem>>, vector<3072x128xbf16>
    %cst = arith.constant dense<0.000000e+00> : vector<2x128xf32>
    %3 = tpu.matmul %1, %2, %cst {dimension_numbers = #tpu.dot_dimension_numbers<[1], [0], [0], [1], [0, 0, 1, 1], [], []>} : vector<2x3072xbf16>, vector<3072x128xbf16>, vector<2x128xf32> -> vector<2x128xf32>
    %c0_3 = arith.constant 0 : index
    %c0_4 = arith.constant 0 : index
    %4 = vector.load %arg3[%c0_3, %c0_4] : memref<1x128xf32, #tpu.memory_space<vmem>>, vector<1x128xf32>
    %5 = vector.broadcast %4 : vector<1x128xf32> to vector<2x128xf32>
    %6 = arith.addf %3, %5 : vector<2x128xf32>
    %cst_5 = arith.constant 5.000000e-01 : f32
    %7 = vector.broadcast %cst_5 : f32 to vector<2x128xf32>
    %8 = arith.mulf %7, %6 : vector<2x128xf32>
    %cst_6 = arith.constant 0.707106769 : f32
    %9 = vector.broadcast %cst_6 : f32 to vector<2x128xf32>
    %10 = arith.mulf %6, %9 : vector<2x128xf32>
    %11 = math.erf %10 : vector<2x128xf32>
    %cst_7 = arith.constant 1.000000e+00 : f32
    %12 = vector.broadcast %cst_7 : f32 to vector<2x128xf32>
    %13 = arith.addf %12, %11 : vector<2x128xf32>
    %14 = arith.mulf %8, %13 : vector<2x128xf32>
    %15 = arith.truncf %14 : vector<2x128xf32> to vector<2x128xbf16>
    %c0_8 = arith.constant 0 : index
    %c0_9 = arith.constant 0 : index
    %16 = vector.load %arg4[%c0_8, %c0_9] : memref<128x128xbf16, #tpu.memory_space<vmem>>, vector<128x128xbf16>
    %cst_10 = arith.constant dense<0.000000e+00> : vector<2x128xf32>
    %17 = tpu.matmul %15, %16, %cst_10 {dimension_numbers = #tpu.dot_dimension_numbers<[1], [0], [0], [1], [0, 0, 1, 1], [], []>} : vector<2x128xbf16>, vector<128x128xbf16>, vector<2x128xf32> -> vector<2x128xf32>
    %c0_11 = arith.constant 0 : index
    %c0_12 = arith.constant 0 : index
    %18 = vector.load %arg5[%c0_11, %c0_12] : memref<1x128xf32, #tpu.memory_space<vmem>>, vector<1x128xf32>
    %19 = vector.broadcast %18 : vector<1x128xf32> to vector<2x128xf32>
    %20 = arith.addf %17, %19 : vector<2x128xf32>
    %cst_13 = arith.constant 5.000000e-01 : f32
    %21 = vector.broadcast %cst_13 : f32 to vector<2x128xf32>
    %22 = arith.mulf %21, %20 : vector<2x128xf32>
    %cst_14 = arith.constant 0.707106769 : f32
    %23 = vector.broadcast %cst_14 : f32 to vector<2x128xf32>
    %24 = arith.mulf %20, %23 : vector<2x128xf32>
    %25 = math.erf %24 : vector<2x128xf32>
    %cst_15 = arith.constant 1.000000e+00 : f32
    %26 = vector.broadcast %cst_15 : f32 to vector<2x128xf32>
    %27 = arith.addf %26, %25 : vector<2x128xf32>
    %28 = arith.mulf %22, %27 : vector<2x128xf32>
    %29 = arith.truncf %28 : vector<2x128xf32> to vector<2x128xbf16>
    %c0_16 = arith.constant 0 : index
    %c0_17 = arith.constant 0 : index
    %30 = vector.load %arg6[%c0_16, %c0_17] : memref<128x128xbf16, #tpu.memory_space<vmem>>, vector<128x128xbf16>
    %cst_18 = arith.constant dense<0.000000e+00> : vector<2x128xf32>
    %31 = tpu.matmul %29, %30, %cst_18 {dimension_numbers = #tpu.dot_dimension_numbers<[1], [0], [0], [1], [0, 0, 1, 1], [], []>} : vector<2x128xbf16>, vector<128x128xbf16>, vector<2x128xf32> -> vector<2x128xf32>
    %c0_19 = arith.constant 0 : index
    %c0_20 = arith.constant 0 : index
    %32 = vector.load %arg7[%c0_19, %c0_20] : memref<1x128xf32, #tpu.memory_space<vmem>>, vector<1x128xf32>
    %33 = vector.broadcast %32 : vector<1x128xf32> to vector<2x128xf32>
    %34 = arith.addf %31, %33 : vector<2x128xf32>
    %c0_21 = arith.constant 0 : index
    %c0_22 = arith.constant 0 : index
    %35 = vector.load %arg8[%c0_21, %c0_22] : memref<2x128xf32, #tpu.memory_space<vmem>>, vector<2x128xf32>
    tpu.vector_store %arg8[%c0_21, %c0_22], %34 {strides = array<i32>} : memref<2x128xf32, #tpu.memory_space<vmem>>, vector<2x128xf32>,
    return
  }
  func.func @transform_0(%arg0: i32) -> (i32, i32) {
    %c0_i32 = arith.constant 0 : i32
    %c0_i32_0 = arith.constant 0 : i32
    return %arg0, %c0_i32 : i32, i32
  }
  func.func @transform_1(%arg0: i32) -> (i32, i32) {
    %c0_i32 = arith.constant 0 : i32
    %c0_i32_0 = arith.constant 0 : i32
    %c0_i32_1 = arith.constant 0 : i32
    return %c0_i32, %c0_i32_0 : i32, i32
  }
  func.func @transform_2(%arg0: i32) -> (i32, i32) {
    %c0_i32 = arith.constant 0 : i32
    %c0_i32_0 = arith.constant 0 : i32
    %c0_i32_1 = arith.constant 0 : i32
    return %c0_i32, %c0_i32_0 : i32, i32
  }
  func.func @transform_3(%arg0: i32) -> (i32, i32) {
    %c0_i32 = arith.constant 0 : i32
    %c0_i32_0 = arith.constant 0 : i32
    %c0_i32_1 = arith.constant 0 : i32
    return %c0_i32, %c0_i32_0 : i32, i32
  }
  func.func @transform_4(%arg0: i32) -> (i32, i32) {
    %c0_i32 = arith.constant 0 : i32
    %c0_i32_0 = arith.constant 0 : i32
    %c0_i32_1 = arith.constant 0 : i32
    return %c0_i32, %c0_i32_0 : i32, i32
  }
  func.func @transform_5(%arg0: i32) -> (i32, i32) {
    %c0_i32 = arith.constant 0 : i32
    %c0_i32_0 = arith.constant 0 : i32
    %c0_i32_1 = arith.constant 0 : i32
    return %c0_i32, %c0_i32_0 : i32, i32
  }
  func.func @transform_6(%arg0: i32) -> (i32, i32) {
    %c0_i32 = arith.constant 0 : i32
    %c0_i32_0 = arith.constant 0 : i32
    %c0_i32_1 = arith.constant 0 : i32
    return %c0_i32, %c0_i32_0 : i32, i32
  }
  func.func @transform_7(%arg0: i32) -> (i32, i32) {
    %c0_i32 = arith.constant 0 : i32
    %c0_i32_0 = arith.constant 0 : i32
    return %arg0, %c0_i32 : i32, i32
  }
}

</mosaic_0001>

<bundles_post_ra>
// kernel: tpu_custom_call.1
= control target key start
LH: loop header
LB: loop body
LE: loop exit
PB: predicated region body
PF: predicated region fallthrough
CT: control target
= control target key end

     0   :  { %12 = vsyncpa [#allocation3], 0  ;;  %s3606_s0 = inlined_call_operand.hbm [shape: f32[2,3072], index: 0, kind: input, shape index: {}]   ;;  %s3607_s1 = inlined_call_operand.hbm [shape: bf16[3072,128], index: 1, kind: input, shape index: {}]   ;;  %s3608_s2 = inlined_call_operand.vmem [shape: f32[1,128], index: 2, kind: input, shape index: {}]   ;;  %s3609_s3 = inlined_call_operand.hbm [shape: bf16[128,128], index: 3, kind: input, shape index: {}]   ;;  %s3610_s4 = inlined_call_operand.vmem [shape: f32[1,128], index: 4, kind: input, shape index: {}]   ;;  %s3611_s5 = inlined_call_operand.hbm [shape: bf16[128,128], index: 5, kind: input, shape index: {}]   ;;  %s3612_s6 = inlined_call_operand.vmem [shape: f32[1,128], index: 6, kind: input, shape index: {}]   ;;  %s3613_s7 = inlined_call_operand.hbm [shape: f32[2,128], index: 7, kind: output, shape index: {}]  }
   0x1   :  { %13 = vsyncpa [#allocation6], 0 }
   0x2   :  { %14 = vsyncpa [#allocation9], 0  ;;  %s31_s26 = sshll.u32 %s3607_s1, 4  ;;  %s32_s26 = int_to_ptr.hbm [resolvable:$true] %s31_s26 }
   0x3   :  { %15 = vsyncpa [#allocation4], 0  ;;  %s3487_s27 = smov [#allocation5]   ;;  %s21_s8 = sshll.u32 %s3606_s0, 4  ;;  %s22_s8 = int_to_ptr.hbm [resolvable:$true] %s21_s8 }
   0x4   :  { %s33_s28 = sshll.u32 %s3487_s27, 4  ;;  %s3488_s9 = smov 64   ;;  %s34_s28 = int_to_ptr.vmem [resolvable:$true] %s33_s28 }
   0x5   :  { %s3489_s10 = smov 4   ;;  %s3490_s11 = smov [#allocation2]  }
   0x6   :  { %39 = dma.hbm_to_vmem [thread:$0]  %s32_s26, 24576, %s34_s28, [#allocation6], %s3488_s9, %s3488_s9, %s3489_s10  }
   0x7   :  { %s23_s12 = sshll.u32 %s3490_s11, 4  ;;  %s46_s15 = sshll.u32 %s3609_s3, 4  ;;  %s24_s12 = int_to_ptr.vmem [resolvable:$true] %s23_s12  ;;  %s47_s15 = int_to_ptr.hbm [resolvable:$true] %s46_s15 }
   0x8   :  { %26 = dma.hbm_to_vmem [thread:$0]  %s22_s8, 768, %s24_s12, [#allocation3]  }
   0x9   :  { %s61_s17 = sshll.u32 %s3611_s5, 4  ;;  %s3491_s18 = smov [#allocation7]   ;;  %s62_s17 = int_to_ptr.hbm [resolvable:$true] %s61_s17 }
   0xa   :  { %s48_s19 = sshll.u32 %s3491_s18, 4  ;;  %s3492_s0 = smov [#allocation8]   ;;  %s49_s19 = int_to_ptr.vmem [resolvable:$true] %s48_s19 }
   0xb   :  { %54 = dma.hbm_to_vmem [thread:$0]  %s47_s15, 1024, %s49_s19, [#allocation6], %s3488_s9, %s3488_s9, %s3489_s10  }
   0xc   :  { %s63_s20 = sshll.u32 %s3492_s0, 4  ;;  %s64_s20 = int_to_ptr.vmem [resolvable:$true] %s63_s20 }
   0xd   :  { %69 = dma.hbm_to_vmem [thread:$0]  %s62_s17, 1024, %s64_s20, [#allocation9], %s3488_s9, %s3488_s9, %s3489_s10  }
   0xe   :  { %3479 = dma.done.wait [#allocation3], 768  }
   0xf   :  { %3480 = vsyncadd [#allocation3], 4294966528 }
  0x10   :  { %3481 = dma.done.wait [#allocation6], 25600  }
  0x11   :  { %3482 = vsyncadd [#allocation6], 4294941696 }
  0x12   :  { %3483 = dma.done.wait [#allocation9], 1024  }
  0x13   :  { %3484 = vsyncadd [#allocation9], 4294966272  ;;  %v3144_v0 = vld [vmem:[#allocation5 + $0x38] sm:$0xff]  ;;  %v3143_v4 = vld [vmem:[#allocation5 + $0x30] sm:$0xff]  ;;  %s3493_s23 = smov [#allocation10]   ;;  %s2291_s27 = sshll.u32 %s3613_s7, 4  ;;  %s2292_s27 = int_to_ptr.hbm [resolvable:$true] %s2291_s27 }
  0x14   :  { %v3152_v1 = vld [vmem:[#allocation5 + $0x78] sm:$0xff]  ;;  %1719 = vmatpush.bf16.msra.mxu0 %v3144_v0  ;;  %v3151_v5 = vld [vmem:[#allocation5 + $0x70] sm:$0xff]  ;;  %v3142_v8 = vld [vmem:[#allocation5 + $0x28] sm:$0xff]  ;;  %s2289_s24 = sshll.u32 %s3493_s23, 4  ;;  %s2290_s24 = int_to_ptr.vmem [resolvable:$true] %s2289_s24 }
  0x15   :  { %v3160_v2 = vld [vmem:[#allocation5 + $0xb8] sm:$0xff]  ;;  %1732 = vmatpush.bf16.msra.mxu1 %v3152_v1  ;;  %v3159_v6 = vld [vmem:[#allocation5 + $0xb0] sm:$0xff]  ;;  %v3150_v9 = vld [vmem:[#allocation5 + $0x68] sm:$0xff] }
  0x16   :  { %v3168_v3 = vld [vmem:[#allocation5 + $0xf8] sm:$0xff]  ;;  %1745 = vmatpush.bf16.msra.mxu2 %v3160_v2  ;;  %v3167_v7 = vld [vmem:[#allocation5 + $0xf0] sm:$0xff]  ;;  %v3158_v10 = vld [vmem:[#allocation5 + $0xa8] sm:$0xff] }
  0x17   :  { %1758 = vmatpush.bf16.msra.mxu3 %v3168_v3  ;;  %v3166_v11 = vld [vmem:[#allocation5 + $0xe8] sm:$0xff]  ;;  %v3141_v12 = vld [vmem:[#allocation5 + $0x20] sm:$0xff]  ;;  %v3140_v16 = vld [vmem:[#allocation5 + $0x18] sm:$0xff] }
  0x18   :  { %1720 = vmatpush.bf16.msra.mxu0 %v3143_v4  ;;  %v3149_v13 = vld [vmem:[#allocation5 + $0x60] sm:$0xff]  ;;  %v3148_v17 = vld [vmem:[#allocation5 + $0x58] sm:$0xff]  ;;  %v3139_v20 = vld [vmem:[#allocation5 + $0x10] sm:$0xff] }
  0x19   :  { %1733 = vmatpush.bf16.msra.mxu1 %v3151_v5  ;;  %v3157_v14 = vld [vmem:[#allocation5 + $0xa0] sm:$0xff]  ;;  %v3156_v18 = vld [vmem:[#allocation5 + $0x98] sm:$0xff]  ;;  %v3147_v21 = vld [vmem:[#allocation5 + $0x50] sm:$0xff] }
  0x1a   :  { %1746 = vmatpush.bf16.msra.mxu2 %v3159_v6  ;;  %v3165_v15 = vld [vmem:[#allocation5 + $0xe0] sm:$0xff]  ;;  %v3164_v19 = vld [vmem:[#allocation5 + $0xd8] sm:$0xff]  ;;  %v88_v22 = vld [vmem:[#allocation2] sm:$0xff] }
  0x1b   :  { %1759 = vmatpush.bf16.msra.mxu3 %v3167_v7  ;;  %100 = vst [vmem:[#allocation1] ss:$4 sm:$0xff] %v88_v22  ;;  %v3155_v23 = vld [vmem:[#allocation5 + $0x90] sm:$0xff]  ;;  %v3138_v25 = vld [vmem:[#allocation5 + $0x8] sm:$0xff]  ;;  %v3137_v29 = vld [vmem:[#allocation5] sm:$0xff] }
  0x1c   :  { %1721 = vmatpush.bf16.msra.mxu0 %v3142_v8  ;;  %v3163_v24 = vld [vmem:[#allocation5 + $0xd0] sm:$0xff]  ;;  %v3146_v26 = vld [vmem:[#allocation5 + $0x48] sm:$0xff]  ;;  %v3145_v30 = vld [vmem:[#allocation5 + $0x40] sm:$0xff] }
  0x1d   :  { %1734 = vmatpush.bf16.msra.mxu1 %v3150_v9  ;;  %v3154_v27 = vld [vmem:[#allocation5 + $0x88] sm:$0xff]  ;;  %v3153_v31 = vld [vmem:[#allocation5 + $0x80] sm:$0xff]  ;;  %v3176_v38 = vld [vmem:[#allocation5 + $0x138] sm:$0xff] }
  0x1e   :  { %1747 = vmatpush.bf16.msra.mxu2 %v3158_v10  ;;  %v3162_v28 = vld [vmem:[#allocation5 + $0xc8] sm:$0xff]  ;;  %v3161_v33 = vld [vmem:[#allocation5 + $0xc0] sm:$0xff]  ;;  %v3184_v39 = vld [vmem:[#allocation5 + $0x178] sm:$0xff] }
  0x1f   :  { %1760 = vmatpush.bf16.msra.mxu3 %v3166_v11  ;;  %v90_v35 = vld [vmem:[#allocation2 + $0x10] sm:$0xff]  ;;  %v3192_v40 = vld [vmem:[#allocation5 + $0x1b8] sm:$0xff]  ;;  %v3175_v47 = vld [vmem:[#allocation5 + $0x130] sm:$0xff] }
  0x20   :  { %1722 = vmatpush.bf16.msra.mxu0 %v3141_v12  ;;  %v3200_v41 = vld [vmem:[#allocation5 + $0x1f8] sm:$0xff]  ;;  %v3183_v48 = vld [vmem:[#allocation5 + $0x170] sm:$0xff]  ;;  %v3174_v51 = vld [vmem:[#allocation5 + $0x128] sm:$0xff] }
  0x21   :  { %1735 = vmatpush.bf16.msra.mxu1 %v3149_v13  ;;  %v89_v42 = vld [vmem:[#allocation2 + $0x8] sm:$0xff]  ;;  %v3191_v49 = vld [vmem:[#allocation5 + $0x1b0] sm:$0xff]  ;;  %v3182_v52 = vld [vmem:[#allocation5 + $0x168] sm:$0xff] }
  0x22   :  { %1748 = vmatpush.bf16.msra.mxu2 %v3157_v14  ;;  %v105_v32 = vld.sshfl [vmem:[#allocation1 + $0x10] sm:$0xff pattern:$0x73625140]  ;;  %v103_v34 = vld.sshfl [vmem:[#allocation1] sm:$0xff pattern:$0x73625140] }
  0x23   :  { %1761 = vmatpush.bf16.msra.mxu3 %v3165_v15  ;;  %v106_v36 = vld.sshfl [vmem:[#allocation1 + $0x18] sm:$0xff pattern:$0x73625140]  ;;  %v104_v37 = vld.sshfl [vmem:[#allocation1 + $0x8] sm:$0xff pattern:$0x73625140]  ;;  %v157_v43 = vpack.c.bf16 %v105_v32, %v105_v32  ;;  %v155_v44 = vpack.c.bf16 %v103_v34, %v103_v34 }
  0x24   :  { %1723 = vmatpush.bf16.msra.mxu0 %v3140_v16  ;;  %111 = vst [vmem:[#allocation1] ss:$4 sm:$0xff] %v90_v35  ;;  %v158_v45 = vpack.c.bf16 %v106_v36, %v106_v36  ;;  %v156_v46 = vpack.c.bf16 %v104_v37, %v104_v37  ;;  %v3199_v50 = vld [vmem:[#allocation5 + $0x1f0] sm:$0xff]  ;;  %v3190_v53 = vld [vmem:[#allocation5 + $0x1a8] sm:$0xff]  ;;  %v3173_v55 = vld [vmem:[#allocation5 + $0x120] sm:$0xff] }
  0x25   :  { %1736 = vmatpush.bf16.msra.mxu1 %v3148_v17  ;;  %102 = vst [vmem:[#allocation1 + $0x20] ss:$4 sm:$0xff] %v89_v42  ;;  %v3198_v54 = vld [vmem:[#allocation5 + $0x1e8] sm:$0xff]  ;;  %v3181_v57 = vld [vmem:[#allocation5 + $0x160] sm:$0xff]  ;;  %v3172_v0 = vld [vmem:[#allocation5 + $0x118] sm:$0xff] }
  0x26   :  { %1749 = vmatpush.bf16.msra.mxu2 %v3156_v18  ;;  %v91_v59 = vld [vmem:[#allocation2 + $0x18] sm:$0xff]  ;;  %v3189_v62 = vld [vmem:[#allocation5 + $0x1a0] sm:$0xff]  ;;  %v3180_v1 = vld [vmem:[#allocation5 + $0x158] sm:$0xff] }
  0x27   :  { %1762 = vmatpush.bf16.msra.mxu3 %v3164_v19  ;;  %v3197_v63 = vld [vmem:[#allocation5 + $0x1e0] sm:$0xff]  ;;  %v3188_v2 = vld [vmem:[#allocation5 + $0x198] sm:$0xff]  ;;  %v3171_v4 = vld [vmem:[#allocation5 + $0x110] sm:$0xff] }
  0x28   :  { %1724 = vmatpush.bf16.msra.mxu0 %v3139_v20  ;;  %v3196_v3 = vld [vmem:[#allocation5 + $0x1d8] sm:$0xff]  ;;  %v3179_v5 = vld [vmem:[#allocation5 + $0x150] sm:$0xff]  ;;  %v3170_v8 = vld [vmem:[#allocation5 + $0x108] sm:$0xff] }
  0x29   :  { %1737 = vmatpush.bf16.msra.mxu1 %v3147_v21  ;;  %v3187_v6 = vld [vmem:[#allocation5 + $0x190] sm:$0xff]  ;;  %v3178_v9 = vld [vmem:[#allocation5 + $0x148] sm:$0xff]  ;;  %v3169_v12 = vld [vmem:[#allocation5 + $0x100] sm:$0xff] }
  0x2a   :  { %1750 = vmatpush.bf16.msra.mxu2 %v3155_v23  ;;  %v3195_v7 = vld [vmem:[#allocation5 + $0x1d0] sm:$0xff]  ;;  %v3186_v10 = vld [vmem:[#allocation5 + $0x188] sm:$0xff]  ;;  %v3177_v13 = vld [vmem:[#allocation5 + $0x140] sm:$0xff] }
  0x2b   :  { %1763 = vmatpush.bf16.msra.mxu3 %v3163_v24  ;;  %v3194_v11 = vld [vmem:[#allocation5 + $0x1c8] sm:$0xff]  ;;  %v3185_v14 = vld [vmem:[#allocation5 + $0x180] sm:$0xff]  ;;  %v3208_v16 = vld [vmem:[#allocation5 + $0x238] sm:$0xff] }
  0x2c   :  { %1725 = vmatpush.bf16.msra.mxu0 %v3138_v25  ;;  %v3546_v56 = vld.sshfl [vmem:[#allocation1 + $0x30] sm:$0xff pattern:$0x73625140]  ;;  %v3548_v58 = vld.sshfl [vmem:[#allocation1 + $0x20] sm:$0xff pattern:$0x73625140] }
  0x2d   :  { %1738 = vmatpush.bf16.msra.mxu1 %v3146_v26  ;;  %v3550_v60 = vld.sshfl [vmem:[#allocation1 + $0x38] sm:$0xff pattern:$0x73625140]  ;;  %v3552_v61 = vld.sshfl [vmem:[#allocation1 + $0x28] sm:$0xff pattern:$0x73625140]  ;;  %v161_v21 = vpack.c.bf16 %v3546_v56, %v3546_v56  ;;  %v159_v22 = vpack.c.bf16 %v3548_v58, %v3548_v58 }
  0x2e   :  { %1751 = vmatpush.bf16.msra.mxu2 %v3154_v27  ;;  %112 = vst [vmem:[#allocation1 + $0x20] ss:$4 sm:$0xff] %v91_v59  ;;  %v3193_v15 = vld [vmem:[#allocation5 + $0x1c0] sm:$0xff]  ;;  %v3216_v17 = vld [vmem:[#allocation5 + $0x278] sm:$0xff]  ;;  %v3207_v20 = vld [vmem:[#allocation5 + $0x230] sm:$0xff]  ;;  %v162_v25 = vpack.c.bf16 %v3550_v60, %v3550_v60  ;;  %v160_v26 = vpack.c.bf16 %v3552_v61, %v3552_v61 }
  0x2f   :  { %1764 = vmatpush.bf16.msra.mxu3 %v3162_v28  ;;  %v3224_v18 = vld [vmem:[#allocation5 + $0x2b8] sm:$0xff]  ;;  %v3215_v23 = vld [vmem:[#allocation5 + $0x270] sm:$0xff]  ;;  %v3562_v27 = vld.sshfl [vmem:[#allocation1] sm:$0xff pattern:$0x73625140] }
  0x30   :  { %1726 = vmatpush.bf16.msra.mxu0 %v3137_v29  ;;  %v3232_v19 = vld [vmem:[#allocation5 + $0x2f8] sm:$0xff]  ;;  %v3223_v24 = vld [vmem:[#allocation5 + $0x2b0] sm:$0xff]  ;;  %v3568_v32 = vld.sshfl [vmem:[#allocation1 + $0x18] sm:$0xff pattern:$0x73625140]  ;;  %v163_v61 = vpack.c.bf16 %v3562_v27, %v3562_v27 }
  0x31   :  { %1739 = vmatpush.bf16.msra.mxu1 %v3145_v30  ;;  %v3564_v28 = vld.sshfl [vmem:[#allocation1 + $0x10] sm:$0xff pattern:$0x73625140]  ;;  %v3566_v29 = vld.sshfl [vmem:[#allocation1 + $0x8] sm:$0xff pattern:$0x73625140] }
  0x32   :  { %1752 = vmatpush.bf16.msra.mxu2 %v3153_v31  ;;  %v3231_v30 = vld [vmem:[#allocation5 + $0x2f0] sm:$0xff]  ;;  %v3214_v34 = vld [vmem:[#allocation5 + $0x268] sm:$0xff]  ;;  %v3205_v37 = vld [vmem:[#allocation5 + $0x220] sm:$0xff] }
  0x33   :  { %1765 = vmatpush.bf16.msra.mxu3 %v3161_v33  ;;  %1727 = vmatmul.bf16.vlgmr.msra.gmra.mxu0 %v155_v44  ;;  %v92_v31 = vld [vmem:[#allocation2 + $0x20] sm:$0xff]  ;;  %v3206_v33 = vld [vmem:[#allocation5 + $0x228] sm:$0xff]  ;;  %v3212_v42 = vld [vmem:[#allocation5 + $0x258] sm:$0xff] }
  0x34   :  { %1771 = vmatpush.bf16.msrb.mxu0 %v3176_v38  ;;  %1740 = vmatmul.bf16.vlgmr.msra.gmra.mxu1 %v156_v46  ;;  %121 = vst [vmem:[#allocation1] ss:$4 sm:$0xff] %v92_v31  ;;  %v3222_v35 = vld [vmem:[#allocation5 + $0x2a8] sm:$0xff]  ;;  %v3213_v38 = vld [vmem:[#allocation5 + $0x260] sm:$0xff]  ;;  %v3228_v44 = vld [vmem:[#allocation5 + $0x2d8] sm:$0xff] }
  0x35   :  { %1784 = vmatpush.bf16.msrb.mxu1 %v3184_v39  ;;  %1753 = vmatmul.bf16.vlgmr.msra.gmra.mxu2 %v157_v43  ;;  %v3230_v36 = vld [vmem:[#allocation5 + $0x2e8] sm:$0xff]  ;;  %v3221_v39 = vld [vmem:[#allocation5 + $0x2a0] sm:$0xff]  ;;  %v3220_v43 = vld [vmem:[#allocation5 + $0x298] sm:$0xff] }
  0x36   :  { %1797 = vmatpush.bf16.msrb.mxu2 %v3192_v40  ;;  %1766 = vmatmul.bf16.vlgmr.msra.gmra.mxu3 %v158_v45  ;;  %v3229_v40 = vld [vmem:[#allocation5 + $0x2e0] sm:$0xff]  ;;  %v3203_v45 = vld [vmem:[#allocation5 + $0x210] sm:$0xff]  ;;  %v3248_v58 = vld [vmem:[#allocation5 + $0x378] sm:$0xff] }
  0x37   :  { %1810 = vmatpush.bf16.msrb.mxu3 %v3200_v41  ;;  %v3204_v41 = vld [vmem:[#allocation5 + $0x218] sm:$0xff]  ;;  %v3211_v46 = vld [vmem:[#allocation5 + $0x250] sm:$0xff]  ;;  %v3225_v56 = vld [vmem:[#allocation5 + $0x2c0] sm:$0xff] }
  0x38   :  { %1772 = vmatpush.bf16.msrb.mxu0 %v3175_v47  ;;  %v3219_v47 = vld [vmem:[#allocation5 + $0x290] sm:$0xff]  ;;  %v3256_v59 = vld [vmem:[#allocation5 + $0x3b8] sm:$0xff]  ;;  %v3242_v27 = vld [vmem:[#allocation5 + $0x348] sm:$0xff] }
  0x39   :  { %1785 = vmatpush.bf16.msrb.mxu1 %v3183_v48  ;;  %v3227_v48 = vld [vmem:[#allocation5 + $0x2d0] sm:$0xff]  ;;  %v3264_v60 = vld [vmem:[#allocation5 + $0x3f8] sm:$0xff]  ;;  %v3241_v31 = vld [vmem:[#allocation5 + $0x340] sm:$0xff] }
  0x3a   :  { %1798 = vmatpush.bf16.msrb.mxu2 %v3191_v49  ;;  %v3202_v49 = vld [vmem:[#allocation5 + $0x208] sm:$0xff] }
  0x3b   :  { %1811 = vmatpush.bf16.msrb.mxu3 %v3199_v50  ;;  %v3210_v50 = vld [vmem:[#allocation5 + $0x248] sm:$0xff] }
  0x3c   :  { %1773 = vmatpush.bf16.msrb.mxu0 %v3174_v51  ;;  %v3218_v51 = vld [vmem:[#allocation5 + $0x288] sm:$0xff] }
  0x3d   :  { %1786 = vmatpush.bf16.msrb.mxu1 %v3182_v52  ;;  %v3226_v52 = vld [vmem:[#allocation5 + $0x2c8] sm:$0xff] }
  0x3e   :  { %1799 = vmatpush.bf16.msrb.mxu2 %v3190_v53  ;;  %v3201_v53 = vld [vmem:[#allocation5 + $0x200] sm:$0xff] }
  0x3f   :  { %1812 = vmatpush.bf16.msrb.mxu3 %v3198_v54  ;;  %v3209_v54 = vld [vmem:[#allocation5 + $0x240] sm:$0xff] }
  0x40   :  { %1774 = vmatpush.bf16.msrb.mxu0 %v3173_v55  ;;  %v3217_v55 = vld [vmem:[#allocation5 + $0x280] sm:$0xff] }
  0x41   :  { %1787 = vmatpush.bf16.msrb.mxu1 %v3181_v57  ;;  %v3240_v57 = vld [vmem:[#allocation5 + $0x338] sm:$0xff] }
  0x42   :  { %1800 = vmatpush.bf16.msrb.mxu2 %v3189_v62  ;;  %v165_v62 = vpack.c.bf16 %v3564_v28, %v3564_v28  ;;  %v3250_v28 = vld [vmem:[#allocation5 + $0x388] sm:$0xff] }
  0x43   :  { %1813 = vmatpush.bf16.msrb.mxu3 %v3197_v63  ;;  %v3239_v63 = vld [vmem:[#allocation5 + $0x330] sm:$0xff] }
  0x44   :  { %1775 = vmatpush.bf16.msrb.mxu0 %v3172_v0  ;;  %v164_v0 = vpack.c.bf16 %v3566_v29, %v3566_v29  ;;  %v3258_v29 = vld [vmem:[#allocation5 + $0x3c8] sm:$0xff] }
  0x45   :  { %1788 = vmatpush.bf16.msrb.mxu1 %v3180_v1  ;;  %v166_v1 = vpack.c.bf16 %v3568_v32, %v3568_v32  ;;  %v3249_v32 = vld [vmem:[#allocation5 + $0x380] sm:$0xff] }
  0x46   :  { %1801 = vmatpush.bf16.msrb.mxu2 %v3188_v2  ;;  %v3247_v2 = vld [vmem:[#allocation5 + $0x370] sm:$0xff] }
  0x47   :  { %1814 = vmatpush.bf16.msrb.mxu3 %v3196_v3  ;;  %v3255_v3 = vld [vmem:[#allocation5 + $0x3b0] sm:$0xff] }
  0x48   :  { %1776 = vmatpush.bf16.msrb.mxu0 %v3171_v4  ;;  %v3578_v4 = vld.sshfl [vmem:[#allocation1 + $0x20] sm:$0xff pattern:$0x73625140] }
  0x49   :  { %1789 = vmatpush.bf16.msrb.mxu1 %v3179_v5  ;;  %v3580_v5 = vld.sshfl [vmem:[#allocation1 + $0x30] sm:$0xff pattern:$0x73625140] }
  0x4a   :  { %1802 = vmatpush.bf16.msrb.mxu2 %v3187_v6  ;;  %v3582_v6 = vld.sshfl [vmem:[#allocation1 + $0x28] sm:$0xff pattern:$0x73625140] }
  0x4b   :  { %1815 = vmatpush.bf16.msrb.mxu3 %v3195_v7  ;;  %v3263_v7 = vld [vmem:[#allocation5 + $0x3f0] sm:$0xff] }
  0x4c   :  { %1777 = vmatpush.bf16.msrb.mxu0 %v3170_v8  ;;  %v93_v8 = vld [vmem:[#allocation2 + $0x28] sm:$0xff] }
  0x4d   :  { %1790 = vmatpush.bf16.msrb.mxu1 %v3178_v9  ;;  %v3584_v9 = vld.sshfl [vmem:[#allocation1 + $0x38] sm:$0xff pattern:$0x73625140] }
  0x4e   :  { %1803 = vmatpush.bf16.msrb.mxu2 %v3186_v10  ;;  %122 = vst [vmem:[#allocation1 + $0x20] ss:$4 sm:$0xff] %v93_v8  ;;  %v3238_v10 = vld [vmem:[#allocation5 + $0x328] sm:$0xff] }
  0x4f   :  { %1816 = vmatpush.bf16.msrb.mxu3 %v3194_v11  ;;  %v3246_v11 = vld [vmem:[#allocation5 + $0x368] sm:$0xff] }
  0x50   :  { %1778 = vmatpush.bf16.msrb.mxu0 %v3169_v12  ;;  %v3254_v12 = vld [vmem:[#allocation5 + $0x3a8] sm:$0xff] }
  0x51   :  { %1791 = vmatpush.bf16.msrb.mxu1 %v3177_v13  ;;  %v3262_v13 = vld [vmem:[#allocation5 + $0x3e8] sm:$0xff] }
  0x52   :  { %1804 = vmatpush.bf16.msrb.mxu2 %v3185_v14  ;;  %v3237_v14 = vld [vmem:[#allocation5 + $0x320] sm:$0xff]  ;;  %v123_v8 = vld.sshfl [vmem:[#allocation1] sm:$0xff pattern:$0x73625140] }
  0x53   :  { %1817 = vmatpush.bf16.msrb.mxu3 %v3193_v15  ;;  %1779 = vmatmul.bf16.vlgmr.msrb.gmra.mxu0 %v159_v22  ;;  %v3245_v15 = vld [vmem:[#allocation5 + $0x360] sm:$0xff]  ;;  %v3235_v22 = vld [vmem:[#allocation5 + $0x310] sm:$0xff] }
  0x54   :  { %1823 = vmatpush.bf16.msra.mxu0 %v3208_v16  ;;  %1792 = vmatmul.bf16.vlgmr.msrb.gmra.mxu1 %v160_v26  ;;  %v3253_v16 = vld [vmem:[#allocation5 + $0x3a0] sm:$0xff]  ;;  %v3234_v26 = vld [vmem:[#allocation5 + $0x308] sm:$0xff] }
  0x55   :  { %1836 = vmatpush.bf16.msra.mxu1 %v3216_v17  ;;  %1805 = vmatmul.bf16.vlgmr.msrb.gmra.mxu2 %v161_v21  ;;  %v3261_v17 = vld [vmem:[#allocation5 + $0x3e0] sm:$0xff]  ;;  %v3260_v21 = vld [vmem:[#allocation5 + $0x3d8] sm:$0xff] }
  0x56   :  { %1849 = vmatpush.bf16.msra.mxu2 %v3224_v18  ;;  %1818 = vmatmul.bf16.vlgmr.msrb.gmra.mxu3 %v162_v25  ;;  %v3236_v18 = vld [vmem:[#allocation5 + $0x318] sm:$0xff]  ;;  %v3259_v25 = vld [vmem:[#allocation5 + $0x3d0] sm:$0xff] }
  0x57   :  { %1862 = vmatpush.bf16.msra.mxu3 %v3232_v19  ;;  %v3244_v19 = vld [vmem:[#allocation5 + $0x358] sm:$0xff] }
  0x58   :  { %1824 = vmatpush.bf16.msra.mxu0 %v3207_v20  ;;  %v3252_v20 = vld [vmem:[#allocation5 + $0x398] sm:$0xff] }
  0x59   :  { %1837 = vmatpush.bf16.msra.mxu1 %v3215_v23  ;;  %v3243_v23 = vld [vmem:[#allocation5 + $0x350] sm:$0xff] }
  0x5a   :  { %1850 = vmatpush.bf16.msra.mxu2 %v3223_v24  ;;  %v3251_v24 = vld [vmem:[#allocation5 + $0x390] sm:$0xff] }
  0x5b   :  { %1863 = vmatpush.bf16.msra.mxu3 %v3231_v30  ;;  %v3233_v30 = vld [vmem:[#allocation5 + $0x300] sm:$0xff] }
  0x5c   :  { %1825 = vmatpush.bf16.msra.mxu0 %v3206_v33  ;;  %v3257_v33 = vld [vmem:[#allocation5 + $0x3c0] sm:$0xff] }
  0x5d   :  { %1838 = vmatpush.bf16.msra.mxu1 %v3214_v34  ;;  %v3272_v34 = vld [vmem:[#allocation5 + $0x438] sm:$0xff] }
  0x5e   :  { %1851 = vmatpush.bf16.msra.mxu2 %v3222_v35  ;;  %v3280_v35 = vld [vmem:[#allocation5 + $0x478] sm:$0xff] }
  0x5f   :  { %1864 = vmatpush.bf16.msra.mxu3 %v3230_v36  ;;  %v3288_v36 = vld [vmem:[#allocation5 + $0x4b8] sm:$0xff] }
  0x60   :  { %1826 = vmatpush.bf16.msra.mxu0 %v3205_v37  ;;  %v3296_v37 = vld [vmem:[#allocation5 + $0x4f8] sm:$0xff] }
  0x61   :  { %1839 = vmatpush.bf16.msra.mxu1 %v3213_v38  ;;  %v167_v38 = vpack.c.bf16 %v3578_v4, %v3578_v4  ;;  %v3281_v4 = vld [vmem:[#allocation5 + $0x480] sm:$0xff] }
  0x62   :  { %1852 = vmatpush.bf16.msra.mxu2 %v3221_v39  ;;  %v169_v39 = vpack.c.bf16 %v3580_v5, %v3580_v5  ;;  %v3289_v5 = vld [vmem:[#allocation5 + $0x4c0] sm:$0xff] }
  0x63   :  { %1865 = vmatpush.bf16.msra.mxu3 %v3229_v40  ;;  %v168_v40 = vpack.c.bf16 %v3582_v6, %v3582_v6  ;;  %v3304_v6 = vld [vmem:[#allocation5 + $0x538] sm:$0xff] }
  0x64   :  { %1827 = vmatpush.bf16.msra.mxu0 %v3204_v41  ;;  %v170_v41 = vpack.c.bf16 %v3584_v9, %v3584_v9  ;;  %v125_v9 = vld.sshfl [vmem:[#allocation1 + $0x10] sm:$0xff pattern:$0x73625140] }
  0x65   :  { %1840 = vmatpush.bf16.msra.mxu1 %v3212_v42  ;;  %v3271_v42 = vld [vmem:[#allocation5 + $0x430] sm:$0xff] }
  0x66   :  { %1853 = vmatpush.bf16.msra.mxu2 %v3220_v43  ;;  %v3279_v43 = vld [vmem:[#allocation5 + $0x470] sm:$0xff] }
  0x67   :  { %1866 = vmatpush.bf16.msra.mxu3 %v3228_v44  ;;  %v3287_v44 = vld [vmem:[#allocation5 + $0x4b0] sm:$0xff] }
  0x68   :  { %1828 = vmatpush.bf16.msra.mxu0 %v3203_v45  ;;  %v3295_v45 = vld [vmem:[#allocation5 + $0x4f0] sm:$0xff] }
  0x69   :  { %1841 = vmatpush.bf16.msra.mxu1 %v3211_v46  ;;  %v3270_v46 = vld [vmem:[#allocation5 + $0x428] sm:$0xff] }
  0x6a   :  { %1854 = vmatpush.bf16.msra.mxu2 %v3219_v47  ;;  %v3278_v47 = vld [vmem:[#allocation5 + $0x468] sm:$0xff] }
  0x6b   :  { %1867 = vmatpush.bf16.msra.mxu3 %v3227_v48  ;;  %v3286_v48 = vld [vmem:[#allocation5 + $0x4a8] sm:$0xff] }
  0x6c   :  { %1829 = vmatpush.bf16.msra.mxu0 %v3202_v49  ;;  %v3294_v49 = vld [vmem:[#allocation5 + $0x4e8] sm:$0xff] }
  0x6d   :  { %1842 = vmatpush.bf16.msra.mxu1 %v3210_v50  ;;  %v3269_v50 = vld [vmem:[#allocation5 + $0x420] sm:$0xff] }
  0x6e   :  { %1855 = vmatpush.bf16.msra.mxu2 %v3218_v51  ;;  %v3277_v51 = vld [vmem:[#allocation5 + $0x460] sm:$0xff] }
  0x6f   :  { %1868 = vmatpush.bf16.msra.mxu3 %v3226_v52  ;;  %v3285_v52 = vld [vmem:[#allocation5 + $0x4a0] sm:$0xff] }
  0x70   :  { %1830 = vmatpush.bf16.msra.mxu0 %v3201_v53  ;;  %v3293_v53 = vld [vmem:[#allocation5 + $0x4e0] sm:$0xff] }
  0x71   :  { %1843 = vmatpush.bf16.msra.mxu1 %v3209_v54  ;;  %v3268_v54 = vld [vmem:[#allocation5 + $0x418] sm:$0xff] }
  0x72   :  { %1856 = vmatpush.bf16.msra.mxu2 %v3217_v55  ;;  %v3276_v55 = vld [vmem:[#allocation5 + $0x458] sm:$0xff] }
  0x73   :  { %1869 = vmatpush.bf16.msra.mxu3 %v3225_v56  ;;  %1831 = vmatmul.bf16.vlgmr.msra.gmra.mxu0 %v163_v61  ;;  %v3284_v56 = vld [vmem:[#allocation5 + $0x498] sm:$0xff]  ;;  %v3291_v61 = vld [vmem:[#allocation5 + $0x4d0] sm:$0xff] }
  0x74   :  { %1875 = vmatpush.bf16.msrb.mxu0 %v3240_v57  ;;  %1844 = vmatmul.bf16.vlgmr.msra.gmra.mxu1 %v164_v0  ;;  %v3292_v57 = vld [vmem:[#allocation5 + $0x4d8] sm:$0xff]  ;;  %v3282_v0 = vld [vmem:[#allocation5 + $0x488] sm:$0xff] }
  0x75   :  { %1888 = vmatpush.bf16.msrb.mxu1 %v3248_v58  ;;  %1857 = vmatmul.bf16.vlgmr.msra.gmra.mxu2 %v165_v62  ;;  %v3267_v58 = vld [vmem:[#allocation5 + $0x410] sm:$0xff]  ;;  %v3266_v62 = vld [vmem:[#allocation5 + $0x408] sm:$0xff] }
  0x76   :  { %1901 = vmatpush.bf16.msrb.mxu2 %v3256_v59  ;;  %1870 = vmatmul.bf16.vlgmr.msra.gmra.mxu3 %v166_v1  ;;  %v3275_v59 = vld [vmem:[#allocation5 + $0x450] sm:$0xff]  ;;  %v3290_v1 = vld [vmem:[#allocation5 + $0x4c8] sm:$0xff] }
  0x77   :  { %1914 = vmatpush.bf16.msrb.mxu3 %v3264_v60  ;;  %v3283_v60 = vld [vmem:[#allocation5 + $0x490] sm:$0xff] }
  0x78   :  { %1876 = vmatpush.bf16.msrb.mxu0 %v3239_v63  ;;  %v3274_v63 = vld [vmem:[#allocation5 + $0x448] sm:$0xff] }
  0x79   :  { %1889 = vmatpush.bf16.msrb.mxu1 %v3247_v2  ;;  %v3265_v2 = vld [vmem:[#allocation5 + $0x400] sm:$0xff] }
  0x7a   :  { %1902 = vmatpush.bf16.msrb.mxu2 %v3255_v3  ;;  %v3273_v3 = vld [vmem:[#allocation5 + $0x440] sm:$0xff] }
  0x7b   :  { %1915 = vmatpush.bf16.msrb.mxu3 %v3263_v7  ;;  %v3312_v7 = vld [vmem:[#allocation5 + $0x578] sm:$0xff] }
  0x7c   :  { %1877 = vmatpush.bf16.msrb.mxu0 %v3238_v10  ;;  %v124_v10 = vld.sshfl [vmem:[#allocation1 + $0x8] sm:$0xff pattern:$0x73625140] }
  0x7d   :  { %1890 = vmatpush.bf16.msrb.mxu1 %v3246_v11  ;;  %v126_v11 = vld.sshfl [vmem:[#allocation1 + $0x18] sm:$0xff pattern:$0x73625140] }
  0x7e   :  { %1903 = vmatpush.bf16.msrb.mxu2 %v3254_v12  ;;  %v3320_v12 = vld [vmem:[#allocation5 + $0x5b8] sm:$0xff] }
  0x7f   :  { %1916 = vmatpush.bf16.msrb.mxu3 %v3262_v13  ;;  %v3328_v13 = vld [vmem:[#allocation5 + $0x5f8] sm:$0xff] }
  0x80   :  { %1878 = vmatpush.bf16.msrb.mxu0 %v3237_v14  ;;  %v171_v14 = vpack.c.bf16 %v123_v8, %v123_v8 }
  0x81   :  { %1891 = vmatpush.bf16.msrb.mxu1 %v3245_v15  ;;  %v173_v15 = vpack.c.bf16 %v125_v9, %v125_v9 }
  0x82   :  { %1904 = vmatpush.bf16.msrb.mxu2 %v3253_v16  ;;  %v172_v16 = vpack.c.bf16 %v124_v10, %v124_v10 }
  0x83   :  { %1917 = vmatpush.bf16.msrb.mxu3 %v3261_v17  ;;  %v174_v17 = vpack.c.bf16 %v126_v11, %v126_v11 }
  0x84   :  { %1879 = vmatpush.bf16.msrb.mxu0 %v3236_v18  ;;  %v3303_v18 = vld [vmem:[#allocation5 + $0x530] sm:$0xff] }
  0x85   :  { %1892 = vmatpush.bf16.msrb.mxu1 %v3244_v19  ;;  %v3311_v19 = vld [vmem:[#allocation5 + $0x570] sm:$0xff] }
  0x86   :  { %1905 = vmatpush.bf16.msrb.mxu2 %v3252_v20  ;;  %v3319_v20 = vld [vmem:[#allocation5 + $0x5b0] sm:$0xff] }
  0x87   :  { %1918 = vmatpush.bf16.msrb.mxu3 %v3260_v21  ;;  %v3327_v21 = vld [vmem:[#allocation5 + $0x5f0] sm:$0xff] }
  0x88   :  { %1880 = vmatpush.bf16.msrb.mxu0 %v3235_v22  ;;  %v3302_v22 = vld [vmem:[#allocation5 + $0x528] sm:$0xff] }
  0x89   :  { %1893 = vmatpush.bf16.msrb.mxu1 %v3243_v23  ;;  %v3310_v23 = vld [vmem:[#allocation5 + $0x568] sm:$0xff] }
  0x8a   :  { %1906 = vmatpush.bf16.msrb.mxu2 %v3251_v24  ;;  %v3352_v24 = vld [vmem:[%s3608_s2] ss:$0 sm:$0xff] }
  0x8b   :  { %1919 = vmatpush.bf16.msrb.mxu3 %v3259_v25  ;;  %v3318_v25 = vld [vmem:[#allocation5 + $0x5a8] sm:$0xff] }
  0x8c   :  { %1881 = vmatpush.bf16.msrb.mxu0 %v3234_v26  ;;  %v3326_v26 = vld [vmem:[#allocation5 + $0x5e8] sm:$0xff] }
  0x8d   :  { %1894 = vmatpush.bf16.msrb.mxu1 %v3242_v27 }
  0x8e   :  { %1907 = vmatpush.bf16.msrb.mxu2 %v3250_v28  ;;  %v3301_v28 = vld [vmem:[#allocation5 + $0x520] sm:$0xff] }
  0x8f   :  { %1920 = vmatpush.bf16.msrb.mxu3 %v3258_v29  ;;  %v3309_v29 = vld [vmem:[#allocation5 + $0x560] sm:$0xff] }
  0x90   :  { %1882 = vmatpush.bf16.msrb.mxu0 %v3233_v30 }
  0x91   :  { %1895 = vmatpush.bf16.msrb.mxu1 %v3241_v31 }
  0x92   :  { %1908 = vmatpush.bf16.msrb.mxu2 %v3249_v32  ;;  %v3317_v32 = vld [vmem:[#allocation5 + $0x5a0] sm:$0xff] }
  0x93   :  { %1921 = vmatpush.bf16.msrb.mxu3 %v3257_v33  ;;  %1883 = vmatmul.bf16.vlgmr.msrb.gmra.mxu0 %v167_v38  ;;  %v3325_v33 = vld [vmem:[#allocation5 + $0x5e0] sm:$0xff]  ;;  %v3324_v38 = vld [vmem:[#allocation5 + $0x5d8] sm:$0xff] }
  0x94   :  { %1927 = vmatpush.bf16.msra.mxu0 %v3272_v34  ;;  %1896 = vmatmul.bf16.vlgmr.msrb.gmra.mxu1 %v168_v40 }
  0x95   :  { %1940 = vmatpush.bf16.msra.mxu1 %v3280_v35  ;;  %1909 = vmatmul.bf16.vlgmr.msrb.gmra.mxu2 %v169_v39  ;;  %v3300_v35 = vld [vmem:[#allocation5 + $0x518] sm:$0xff] }
  0x96   :  { %1953 = vmatpush.bf16.msra.mxu2 %v3288_v36  ;;  %1922 = vmatmul.bf16.vlgmr.msrb.gmra.mxu3 %v170_v41  ;;  %v3308_v36 = vld [vmem:[#allocation5 + $0x558] sm:$0xff] }
  0x97   :  { %1966 = vmatpush.bf16.msra.mxu3 %v3296_v37  ;;  %v3316_v37 = vld [vmem:[#allocation5 + $0x598] sm:$0xff] }
  0x98   :  { %1928 = vmatpush.bf16.msra.mxu0 %v3271_v42 }
  0x99   :  { %1941 = vmatpush.bf16.msra.mxu1 %v3279_v43  ;;  %v3299_v43 = vld [vmem:[#allocation5 + $0x510] sm:$0xff] }
  0x9a   :  { %1954 = vmatpush.bf16.msra.mxu2 %v3287_v44  ;;  %v3307_v44 = vld [vmem:[#allocation5 + $0x550] sm:$0xff] }
  0x9b   :  { %1967 = vmatpush.bf16.msra.mxu3 %v3295_v45 }
  0x9c   :  { %1929 = vmatpush.bf16.msra.mxu0 %v3270_v46 }
  0x9d   :  { %1942 = vmatpush.bf16.msra.mxu1 %v3278_v47  ;;  %v3315_v47 = vld [vmem:[#allocation5 + $0x590] sm:$0xff] }
  0x9e   :  { %1955 = vmatpush.bf16.msra.mxu2 %v3286_v48  ;;  %v3323_v48 = vld [vmem:[#allocation5 + $0x5d0] sm:$0xff] }
  0x9f   :  { %1968 = vmatpush.bf16.msra.mxu3 %v3294_v49  ;;  %v3298_v49 = vld [vmem:[#allocation5 + $0x508] sm:$0xff] }
  0xa0   :  { %1930 = vmatpush.bf16.msra.mxu0 %v3269_v50  ;;  %v3306_v50 = vld [vmem:[#allocation5 + $0x548] sm:$0xff] }
  0xa1   :  { %1943 = vmatpush.bf16.msra.mxu1 %v3277_v51  ;;  %v3314_v51 = vld [vmem:[#allocation5 + $0x588] sm:$0xff] }
  0xa2   :  { %1956 = vmatpush.bf16.msra.mxu2 %v3285_v52  ;;  %v3322_v52 = vld [vmem:[#allocation5 + $0x5c8] sm:$0xff] }
  0xa3   :  { %1969 = vmatpush.bf16.msra.mxu3 %v3293_v53 }
  0xa4   :  { %1931 = vmatpush.bf16.msra.mxu0 %v3268_v54  ;;  %v3297_v54 = vld [vmem:[#allocation5 + $0x500] sm:$0xff] }
  0xa5   :  { %1944 = vmatpush.bf16.msra.mxu1 %v3276_v55 }
  0xa6   :  { %1957 = vmatpush.bf16.msra.mxu2 %v3284_v56  ;;  %v3305_v56 = vld [vmem:[#allocation5 + $0x540] sm:$0xff] }
  0xa7   :  { %1970 = vmatpush.bf16.msra.mxu3 %v3292_v57  ;;  %v3313_v57 = vld [vmem:[#allocation5 + $0x580] sm:$0xff] }
  0xa8   :  { %1932 = vmatpush.bf16.msra.mxu0 %v3267_v58  ;;  %v3321_v58 = vld [vmem:[#allocation5 + $0x5c0] sm:$0xff] }
  0xa9   :  { %1945 = vmatpush.bf16.msra.mxu1 %v3275_v59  ;;  %v127_v59 = vld.sshfl [vmem:[#allocation1 + $0x20] sm:$0xff pattern:$0x73625140] }
  0xaa   :  { %1958 = vmatpush.bf16.msra.mxu2 %v3283_v60  ;;  %v128_v60 = vld.sshfl [vmem:[#allocation1 + $0x28] sm:$0xff pattern:$0x73625140] }
  0xab   :  { %1971 = vmatpush.bf16.msra.mxu3 %v3291_v61  ;;  %v129_v61 = vld.sshfl [vmem:[#allocation1 + $0x30] sm:$0xff pattern:$0x73625140] }
  0xac   :  { %1933 = vmatpush.bf16.msra.mxu0 %v3266_v62  ;;  %v130_v62 = vld.sshfl [vmem:[#allocation1 + $0x38] sm:$0xff pattern:$0x73625140] }
  0xad   :  { %1946 = vmatpush.bf16.msra.mxu1 %v3274_v63  ;;  %v175_v63 = vpack.c.bf16 %v127_v59, %v127_v59 }
  0xae   :  { %1959 = vmatpush.bf16.msra.mxu2 %v3282_v0  ;;  %v176_v0 = vpack.c.bf16 %v128_v60, %v128_v60 }
  0xaf   :  { %1972 = vmatpush.bf16.msra.mxu3 %v3290_v1  ;;  %v177_v1 = vpack.c.bf16 %v129_v61, %v129_v61 }
  0xb0   :  { %1934 = vmatpush.bf16.msra.mxu0 %v3265_v2  ;;  %v1728_v27 = vpop.f32.mrf.mxu0  ;;  %v178_v2 = vpack.c.bf16 %v130_v62, %v130_v62  ;;  %v3334_v62 = vld [vmem:[#allocation7 + $0x28] sm:$0xff] }
  0xb1   :  { %1947 = vmatpush.bf16.msra.mxu1 %v3273_v3  ;;  %v1729_v30 = vadd.f32 %v3352_v24, %v1728_v27  ;;  %v1741_v31 = vpop.f32.mrf.mxu1 }
  0xb2   :  { %1960 = vmatpush.bf16.msra.mxu2 %v3281_v4 }
  0xb3   :  { %1973 = vmatpush.bf16.msra.mxu3 %v3289_v5  ;;  %1935 = vmatmul.bf16.vlgmr.msra.gmra.mxu0 %v171_v14  ;;  %v1742_v34 = vadd.f32 %v1741_v31, %v1729_v30 }
  0xb4   :  { %1979 = vmatpush.bf16.msrb.mxu0 %v3304_v6  ;;  %1948 = vmatmul.bf16.vlgmr.msra.gmra.mxu1 %v172_v16 }
  0xb5   :  { %1992 = vmatpush.bf16.msrb.mxu1 %v3312_v7  ;;  %1961 = vmatmul.bf16.vlgmr.msra.gmra.mxu2 %v173_v15 }
  0xb6   :  { %2005 = vmatpush.bf16.msrb.mxu2 %v3320_v12  ;;  %1974 = vmatmul.bf16.vlgmr.msra.gmra.mxu3 %v174_v17 }
  0xb7   :  { %2018 = vmatpush.bf16.msrb.mxu3 %v3328_v13 }
  0xb8   :  { %1980 = vmatpush.bf16.msrb.mxu0 %v3303_v18  ;;  %v1754_v39 = vpop.f32.mrf.mxu2  ;;  %v1730_v42 = vpop.f32.mrf.mxu0 }
  0xb9   :  { %1993 = vmatpush.bf16.msrb.mxu1 %v3311_v19  ;;  %v1755_v40 = vadd.f32 %v1754_v39, %v1742_v34  ;;  %v1767_v41 = vpop.f32.mrf.mxu3  ;;  %v1743_v46 = vpop.f32.mrf.mxu1 }
  0xba   :  { %2006 = vmatpush.bf16.msrb.mxu2 %v3319_v20 }
  0xbb   :  { %2019 = vmatpush.bf16.msrb.mxu3 %v3327_v21  ;;  %v1768_v45 = vadd.f32 %v1767_v41, %v1755_v40 }
  0xbc   :  { %1981 = vmatpush.bf16.msrb.mxu0 %v3302_v22 }
  0xbd   :  { %1994 = vmatpush.bf16.msrb.mxu1 %v3310_v23 }
  0xbe   :  { %2007 = vmatpush.bf16.msrb.mxu2 %v3318_v25 }
  0xbf   :  { %2020 = vmatpush.bf16.msrb.mxu3 %v3326_v26 }
  0xc0   :  { %1982 = vmatpush.bf16.msrb.mxu0 %v3301_v28  ;;  %v1756_v53 = vpop.f32.mrf.mxu2 }
  0xc1   :  { %1995 = vmatpush.bf16.msrb.mxu1 %v3309_v29  ;;  %v1769_v55 = vpop.f32.mrf.mxu3  ;;  %v3336_v53 = vld [vmem:[#allocation7 + $0x38] sm:$0xff] }
  0xc2   :  { %2008 = vmatpush.bf16.msrb.mxu2 %v3317_v32  ;;  %v3335_v55 = vld [vmem:[#allocation7 + $0x30] sm:$0xff] }
  0xc3   :  { %2021 = vmatpush.bf16.msrb.mxu3 %v3325_v33 }
  0xc4   :  { %1983 = vmatpush.bf16.msrb.mxu0 %v3300_v35 }
  0xc5   :  { %1996 = vmatpush.bf16.msrb.mxu1 %v3308_v36 }
  0xc6   :  { %2009 = vmatpush.bf16.msrb.mxu2 %v3316_v37 }
  0xc7   :  { %2022 = vmatpush.bf16.msrb.mxu3 %v3324_v38 }
  0xc8   :  { %1984 = vmatpush.bf16.msrb.mxu0 %v3299_v43 }
  0xc9   :  { %1997 = vmatpush.bf16.msrb.mxu1 %v3307_v44 }
  0xca   :  { %2010 = vmatpush.bf16.msrb.mxu2 %v3315_v47 }
  0xcb   :  { %2023 = vmatpush.bf16.msrb.mxu3 %v3323_v48 }
  0xcc   :  { %1985 = vmatpush.bf16.msrb.mxu0 %v3298_v49 }
  0xcd   :  { %1998 = vmatpush.bf16.msrb.mxu1 %v3306_v50 }
  0xce   :  { %2011 = vmatpush.bf16.msrb.mxu2 %v3314_v51 }
  0xcf   :  { %2024 = vmatpush.bf16.msrb.mxu3 %v3322_v52 }
  0xd0   :  { %1986 = vmatpush.bf16.msrb.mxu0 %v3297_v54  ;;  %v1780_v3 = vpop.f32.mrf.mxu0 }
  0xd1   :  { %1999 = vmatpush.bf16.msrb.mxu1 %v3305_v56  ;;  %v1781_v4 = vadd.f32 %v1780_v3, %v1768_v45  ;;  %v1793_v5 = vpop.f32.mrf.mxu1 }
  0xd2   :  { %2012 = vmatpush.bf16.msrb.mxu2 %v3313_v57 }
  0xd3   :  { %2025 = vmatpush.bf16.msrb.mxu3 %v3321_v58  ;;  %1987 = vmatmul.bf16.vlgmr.msrb.gmra.mxu0 %v175_v63  ;;  %v1794_v6 = vadd.f32 %v1793_v5, %v1781_v4 }
  0xd4   :  { %2000 = vmatmul.bf16.vlgmr.msrb.gmra.mxu1 %v176_v0  ;;  %2144 = vmatpush.bf16.msra.mxu0 %v3336_v53 }
  0xd5   :  { %2013 = vmatmul.bf16.vlgmr.msrb.gmra.mxu2 %v177_v1  ;;  %v3333_v1 = vld [vmem:[#allocation7 + $0x20] sm:$0xff] }
  0xd6   :  { %2026 = vmatmul.bf16.vlgmr.msrb.gmra.mxu3 %v178_v2 }
  0xd8   :  { %v1806_v7 = vpop.f32.mrf.mxu2  ;;  %v1782_v10 = vpop.f32.mrf.mxu0  ;;  %2145 = vmatpush.bf16.msra.mxu0 %v3335_v55 }
  0xd9   :  { %v1807_v8 = vadd.f32 %v1806_v7, %v1794_v6  ;;  %v1819_v9 = vpop.f32.mrf.mxu3  ;;  %v1795_v12 = vpop.f32.mrf.mxu1  ;;  %v3332_v6 = vld [vmem:[#allocation7 + $0x18] sm:$0xff] }
  0xdb   :  { %v1820_v11 = vadd.f32 %v1819_v9, %v1807_v8 }
  0xdc   :  { %2146 = vmatpush.bf16.msra.mxu0 %v3334_v62 }
  0xe0   :  { %v1808_v13 = vpop.f32.mrf.mxu2  ;;  %2147 = vmatpush.bf16.msra.mxu0 %v3333_v1 }
  0xe1   :  { %v1821_v14 = vpop.f32.mrf.mxu3 }
  0xe4   :  { %2148 = vmatpush.bf16.msra.mxu0 %v3332_v6 }
  0xf0   :  { %v1832_v15 = vpop.f32.mrf.mxu0 }
  0xf1   :  { %v1833_v16 = vadd.f32 %v1832_v15, %v1820_v11  ;;  %v1845_v17 = vpop.f32.mrf.mxu1  ;;  %v3331_v11 = vld [vmem:[#allocation7 + $0x10] sm:$0xff] }
  0xf2   :  { %2149 = vmatpush.bf16.msra.mxu0 %v3331_v11 }
  0xf3   :  { %v1846_v18 = vadd.f32 %v1845_v17, %v1833_v16  ;;  %v3330_v16 = vld [vmem:[#allocation7 + $0x8] sm:$0xff] }
  0xf6   :  { %2150 = vmatpush.bf16.msra.mxu0 %v3330_v16 }
  0xf8   :  { %v1858_v19 = vpop.f32.mrf.mxu2  ;;  %v1834_v22 = vpop.f32.mrf.mxu0 }
  0xf9   :  { %v1859_v20 = vadd.f32 %v1858_v19, %v1846_v18  ;;  %v1871_v21 = vpop.f32.mrf.mxu3  ;;  %v1847_v24 = vpop.f32.mrf.mxu1 }
  0xfb   :  { %v1872_v23 = vadd.f32 %v1871_v21, %v1859_v20  ;;  %v3329_v20 = vld [vmem:[#allocation7] sm:$0xff] }
  0xfc   :  { %2151 = vmatpush.bf16.msra.mxu0 %v3329_v20 }
 0x100   :  { %v1860_v25 = vpop.f32.mrf.mxu2 }
 0x101   :  { %v1873_v26 = vpop.f32.mrf.mxu3 }
 0x110   :  { %v1884_v27 = vpop.f32.mrf.mxu0 }
 0x111   :  { %v1897_v28 = vpop.f32.mrf.mxu1  ;;  %v1885_v38 = vadd.f32 %v1884_v27, %v1872_v23 }
 0x113   :  { %v1898_v42 = vadd.f32 %v1897_v28, %v1885_v38 }
 0x118   :  { %v1910_v29 = vpop.f32.mrf.mxu2  ;;  %v1886_v31 = vpop.f32.mrf.mxu0 }
 0x119   :  { %v1923_v30 = vpop.f32.mrf.mxu3  ;;  %v1899_v32 = vpop.f32.mrf.mxu1  ;;  %v1911_v43 = vadd.f32 %v1910_v29, %v1898_v42 }
 0x11b   :  { %v1924_v46 = vadd.f32 %v1923_v30, %v1911_v43 }
 0x120   :  { %v1912_v33 = vpop.f32.mrf.mxu2 }
 0x121   :  { %v1925_v34 = vpop.f32.mrf.mxu3 }
 0x130   :  { %v1936_v35 = vpop.f32.mrf.mxu0 }
 0x131   :  { %v1949_v36 = vpop.f32.mrf.mxu1  ;;  %v1937_v47 = vadd.f32 %v1936_v35, %v1924_v46 }
 0x133   :  { %v1950_v48 = vadd.f32 %v1949_v36, %v1937_v47  ;;  %v3344_v47 = vld [vmem:[#allocation8 + $0x38] sm:$0xff] }
 0x134   :  { %2270 = vmatpush.bf16.msra.mxu1 %v3344_v47 }
 0x138   :  { %v1962_v37 = vpop.f32.mrf.mxu2  ;;  %v1938_v40 = vpop.f32.mrf.mxu0 }
 0x139   :  { %v1975_v39 = vpop.f32.mrf.mxu3  ;;  %v1951_v41 = vpop.f32.mrf.mxu1  ;;  %v1963_v49 = vadd.f32 %v1962_v37, %v1950_v48  ;;  %v3343_v48 = vld [vmem:[#allocation8 + $0x30] sm:$0xff] }
 0x13a   :  { %2271 = vmatpush.bf16.msra.mxu1 %v3343_v48 }
 0x13b   :  { %v1976_v50 = vadd.f32 %v1975_v39, %v1963_v49  ;;  %v3353_v49 = vld [vmem:[%s3610_s4] ss:$0 sm:$0xff] }
 0x140   :  { %v1964_v44 = vpop.f32.mrf.mxu2 }
 0x141   :  { %v1977_v45 = vpop.f32.mrf.mxu3 }
 0x150   :  { %v1988_v51 = vpop.f32.mrf.mxu0 }
 0x151   :  { %v2001_v52 = vpop.f32.mrf.mxu1  ;;  %v1989_v54 = vadd.f32 %v1988_v51, %v1976_v50  ;;  %v3342_v51 = vld [vmem:[#allocation8 + $0x28] sm:$0xff] }
 0x152   :  { %2272 = vmatpush.bf16.msra.mxu1 %v3342_v51 }
 0x153   :  { %v2002_v56 = vadd.f32 %v2001_v52, %v1989_v54  ;;  %v3341_v54 = vld [vmem:[#allocation8 + $0x20] sm:$0xff] }
 0x156   :  { %2273 = vmatpush.bf16.msra.mxu1 %v3341_v54 }
 0x158   :  { %v2014_v57 = vpop.f32.mrf.mxu2  ;;  %v1990_v60 = vpop.f32.mrf.mxu0 }
 0x159   :  { %v2027_v58 = vpop.f32.mrf.mxu3  ;;  %v2015_v59 = vadd.f32 %v2014_v57, %v2002_v56  ;;  %v2003_v61 = vpop.f32.mrf.mxu1 }
 0x15b   :  { %v2028_v63 = vadd.f32 %v2027_v58, %v2015_v59  ;;  %v3340_v58 = vld [vmem:[#allocation8 + $0x18] sm:$0xff] }
 0x15c   :  { %2274 = vmatpush.bf16.msra.mxu1 %v3340_v58 }
 0x15d   :  { %v2032_v0 = vmul.f32 0.70710677, %v2028_v63  ;;  %v2031_v43 = vmul.f32 0.5, %v2028_v63  ;;  %v3339_v63 = vld [vmem:[#allocation8 + $0x10] sm:$0xff] }
 0x15f   :  { %v2033_v2 = vmul.f32 %v2032_v0, %v2032_v0 }
 0x160   :  { %v2016_v3 = vpop.f32.mrf.mxu2  ;;  %2275 = vmatpush.bf16.msra.mxu1 %v3339_v63 }
 0x161   :  { %v2029_v4 = vpop.f32.mrf.mxu3  ;;  %v2034_v5 = vmin.f32 %v2033_v2, 16.0 }
 0x162   :  { %v3338_v4 = vld [vmem:[#allocation8 + $0x8] sm:$0xff] }
 0x163   :  { %v2035_v7 = vmul.f32 2.1237322e-06, %v2034_v5  ;;  %v2046_v8 = vmul.f32 3.8918573e-05, %v2034_v5 }
 0x164   :  { %2276 = vmatpush.bf16.msra.mxu1 %v3338_v4 }
 0x165   :  { %v2036_v9 = vadd.f32 0.00028619796, %v2035_v7  ;;  %v2047_v10 = vadd.f32 0.001143296, %v2046_v8  ;;  %v3337_v8 = vld [vmem:[#allocation8] sm:$0xff] }
 0x167   :  { %v2037_v12 = vmul.f32 %v2036_v9, %v2034_v5  ;;  %v2048_v13 = vmul.f32 %v2047_v10, %v2034_v5 }
 0x168   :  { %2277 = vmatpush.bf16.msra.mxu1 %v3337_v8 }
 0x169   :  { %v2049_v14 = vadd.f32 0.014752088, %v2048_v13  ;;  %v2038_v15 = vadd.f32 0.0036580483, %v2037_v12 }
 0x16b   :  { %v2050_v17 = vmul.f32 %v2049_v14, %v2034_v5  ;;  %v2039_v19 = vmul.f32 %v2038_v15, %v2034_v5 }
 0x16d   :  { %v2051_v18 = vadd.f32 0.112945676, %v2050_v17  ;;  %v2040_v23 = vadd.f32 0.05243302, %v2039_v19 }
 0x16f   :  { %v2052_v21 = vmul.f32 %v2051_v18, %v2034_v5  ;;  %v2041_v26 = vmul.f32 %v2040_v23, %v2034_v5 }
 0x171   :  { %v2053_v22 = vadd.f32 0.4994258, %v2052_v21  ;;  %v2042_v27 = vadd.f32 0.18741608, %v2041_v26 }
 0x173   :  { %v2054_v24 = vmul.f32 %v2053_v22, %v2034_v5  ;;  %v2043_v29 = vmul.f32 %v2042_v27, %v2034_v5 }
 0x175   :  { %v2055_v25 = vadd.f32 1.0, %v2054_v24  ;;  %v2044_v33 = vadd.f32 1.1283791, %v2043_v29 }
 0x177   :  { %3355 = vrcp.f32 %v2055_v25  ;;  %v2067_v32 = vand.u32 2147483648, %v2055_v25  ;;  %v2065_v35 = vand.u32 2147483647, %v2055_v25  ;;  %vm2061_vm1 = vweird.f32 %v2055_v25 }
 0x178   :  { %v2045_v38 = vmul.f32 %v2044_v33, %v2032_v0 }
 0x179   :  { %v2068_v37 = vor.u32 1.1754944e-38, %v2067_v32  ;;  %vm2066_vm3 = vcmp.eq.f32.partialorder %v2065_v35, 8.507059e+37  ;;  %v3354_v35 = vld [vmem:[%s3612_s6] ss:$0 sm:$0xff] }
 0x17d   :  { %v3356_v28 = vpop.eup %3355 }
 0x17e   :  { %v2057_v30 = vmul.f32 %v3356_v28, %v2055_v25  ;;  %vm2062_vm0 = vweird.f32 %v3356_v28 }
 0x17f   :  { %vm2063_vm2 = vmor %vm2061_vm1, %vm2062_vm0 }
 0x180   :  { %v2058_v31 = vsub.f32 1.0, %v2057_v30 }
 0x182   :  { %v2059_v34 = vmul.f32 %v3356_v28, %v2058_v31 }
 0x184   :  { %v2060_v36 = vadd.f32 %v3356_v28, %v2059_v34 }
 0x186   :  { %v2064_v39 = vsel %vm2063_vm2, %v3356_v28, %v2060_v36 }
 0x187   :  { %v2069_v40 = vsel %vm2066_vm3, %v2068_v37, %v2064_v39 }
 0x188   :  { %v2070_v41 = vmul.f32 %v2069_v40, %v2045_v38 }
 0x18a   :  { %v3071_v42 = vclamps-f32 %v2070_v41, 1.0 }
 0x18c   :  { %v2073_v44 = vadd.f32 1.0, %v3071_v42 }
 0x18e   :  { %v2074_v45 = vmul.f32 %v2073_v44, %v2031_v43 }
 0x190   :  { %v2075_v46 = vpack.c.bf16 %v2074_v45, %v2074_v45 }
 0x192   :  { %2152 = vmatmul.bf16.vlgmr.msra.gmra.mxu0 %v2075_v46 }
 0x20f   :  { %v2153_v50 = vpop.f32.mrf.mxu0 }
 0x210   :  { %v2154_v52 = vadd.f32 %v3353_v49, %v2153_v50 }
 0x212   :  { %v2158_v53 = vmul.f32 0.70710677, %v2154_v52  ;;  %v2157_v31 = vmul.f32 0.5, %v2154_v52 }
 0x214   :  { %v2159_v55 = vmul.f32 %v2158_v53, %v2158_v53 }
 0x216   :  { %v2160_v56 = vmin.f32 %v2159_v55, 16.0 }
 0x217   :  { %v2155_v57 = vpop.f32.mrf.mxu0 }
 0x218   :  { %v2161_v59 = vmul.f32 2.1237322e-06, %v2160_v56  ;;  %v2172_v60 = vmul.f32 3.8918573e-05, %v2160_v56 }
 0x21a   :  { %v2162_v61 = vadd.f32 0.00028619796, %v2161_v59  ;;  %v2173_v62 = vadd.f32 0.001143296, %v2172_v60 }
 0x21c   :  { %v2163_v0 = vmul.f32 %v2162_v61, %v2160_v56  ;;  %v2174_v1 = vmul.f32 %v2173_v62, %v2160_v56 }
 0x21e   :  { %v2175_v2 = vadd.f32 0.014752088, %v2174_v1  ;;  %v2164_v3 = vadd.f32 0.0036580483, %v2163_v0 }
 0x220   :  { %v2176_v5 = vmul.f32 %v2175_v2, %v2160_v56  ;;  %v2165_v7 = vmul.f32 %v2164_v3, %v2160_v56 }
 0x222   :  { %v2177_v6 = vadd.f32 0.112945676, %v2176_v5  ;;  %v2166_v11 = vadd.f32 0.05243302, %v2165_v7 }
 0x224   :  { %v2178_v9 = vmul.f32 %v2177_v6, %v2160_v56  ;;  %v2167_v14 = vmul.f32 %v2166_v11, %v2160_v56 }
 0x226   :  { %v2179_v10 = vadd.f32 0.4994258, %v2178_v9  ;;  %v2168_v15 = vadd.f32 0.18741608, %v2167_v14 }
 0x228   :  { %v2180_v12 = vmul.f32 %v2179_v10, %v2160_v56  ;;  %v2169_v17 = vmul.f32 %v2168_v15, %v2160_v56 }
 0x22a   :  { %v2181_v13 = vadd.f32 1.0, %v2180_v12  ;;  %v2170_v21 = vadd.f32 1.1283791, %v2169_v17 }
 0x22c   :  { %3357 = vrcp.f32 %v2181_v13  ;;  %v2193_v20 = vand.u32 2147483648, %v2181_v13  ;;  %v2191_v23 = vand.u32 2147483647, %v2181_v13  ;;  %vm2187_vm5 = vweird.f32 %v2181_v13 }
 0x22d   :  { %v2171_v26 = vmul.f32 %v2170_v21, %v2158_v53 }
 0x22e   :  { %v2194_v25 = vor.u32 1.1754944e-38, %v2193_v20  ;;  %vm2192_vm7 = vcmp.eq.f32.partialorder %v2191_v23, 8.507059e+37 }
 0x232   :  { %v3358_v16 = vpop.eup %3357 }
 0x233   :  { %v2183_v18 = vmul.f32 %v3358_v16, %v2181_v13  ;;  %vm2188_vm4 = vweird.f32 %v3358_v16 }
 0x234   :  { %vm2189_vm6 = vmor %vm2187_vm5, %vm2188_vm4 }
 0x235   :  { %v2184_v19 = vsub.f32 1.0, %v2183_v18 }
 0x237   :  { %v2185_v22 = vmul.f32 %v3358_v16, %v2184_v19 }
 0x239   :  { %v2186_v24 = vadd.f32 %v3358_v16, %v2185_v22 }
 0x23b   :  { %v2190_v27 = vsel %vm2189_vm6, %v3358_v16, %v2186_v24 }
 0x23c   :  { %v2195_v28 = vsel %vm2192_vm7, %v2194_v25, %v2190_v27 }
 0x23d   :  { %v2196_v29 = vmul.f32 %v2195_v28, %v2171_v26 }
 0x23f   :  { %v3104_v30 = vclamps-f32 %v2196_v29, 1.0 }
 0x241   :  { %v2199_v32 = vadd.f32 1.0, %v3104_v30 }
 0x243   :  { %v2200_v33 = vmul.f32 %v2199_v32, %v2157_v31 }
 0x245   :  { %v2201_v34 = vpack.c.bf16 %v2200_v33, %v2200_v33 }
 0x247   :  { %2278 = vmatmul.bf16.vlgmr.msra.gmra.mxu1 %v2201_v34 }
 0x2c4   :  { %v2279_v36 = vpop.f32.mrf.mxu1 }
 0x2c5   :  { %v2280_v37 = vadd.f32 %v3354_v35, %v2279_v36 }
 0x2c7   :  { %2283 = vst [vmem:[#allocation10] sm:$0x3] %v2280_v37 }
 0x2c8   :  { %2294 = dma.vmem_to_hbm [thread:$0]  %s2290_s24, 32, %s2292_s27, [#allocation4]  }
 0x2cc   :  { %v2281_v38 = vpop.f32.mrf.mxu1 }
 0x2cd   :  { %3485 = dma.done.wait [#allocation4], 32  }
 0x2ce   :  { %3486 = vsyncadd [#allocation4], 4294967264 }
 0x2cf   :  { %2299 = vsyncpa [#allocation3], 1 }
 0x2d0   :  { %2300 = vsyncpa [#allocation6], 1 }
 0x2d1   :  { %2301 = vsyncpa [#allocation9], 1 }
 0x2d2   :  { %2302 = vsyncpa [#allocation4], 1 }

</bundles_post_ra>
